<compile_context>
chip_gen: v7x
topology: tpu7x:2x2x1
jax: 0.10.0
libtpu: 0.0.40
codegen_flags: <defaults>
</compile_context>

<pallas_src>
import numpy as np
import jax
import jax.numpy as jnp
from jax import lax
from jax.experimental import pallas as pl
from jax.experimental.pallas import tpu as pltpu


def _make_kernel(B, C, W, H):
    """Kernel closure over the static per-block batch B and image dims."""

    def kernel(x_ref, w_ref, b_ref, s_ref, st_ref, o_ref):
        # Grid-invariant operands: load once per grid step, hoisted out of the
        # per-image loop.  Static slices of the fused (O, 3C) weight.
        w = w_ref[...]                       # (O, 3C)  MXU dtype
        wx = w[:, :C]                        # (O, C)   x-branch weights
        wv = w[:, C:2 * C]                   # (O, C)   v_dist-branch weights
        wh = w[:, 2 * C:]                    # (O, C)   h_dist-branch weights
        b = b_ref[...].astype(jnp.float32)   # (O, 1)
        s = s_ref[...]                       # (HWp, W+H) fused [scol | srow]
        st = st_ref[...]                     # (W+H, HWp) fused [scolT ; srowT]

        def body(i, carry):
            x = x_ref[i]                     # (C, HWp), lane-dense, MXU dtype

            # Fused H-/W-reductions as ONE lane-dense matmul against the 0/1
            # selector matrix, f32 accumulation:
            #   cr[:, :W] = sum over H,  cr[:, W:] = sum over W.
            cr = jnp.dot(x, s, preferred_element_type=jnp.float32)  # (C, W+H)
            col = cr[:, :W]
            row = cr[:, W:]

            # Stable softmaxes in f32 on full-lane tiles.
            col = col - jnp.max(col, axis=1, keepdims=True)
            ev = jnp.exp(col)
            v = ev / jnp.sum(ev, axis=1, keepdims=True)              # (C, W)
            row = row - jnp.max(row, axis=1, keepdims=True)
            eh = jnp.exp(row)
            h = eh / jnp.sum(eh, axis=1, keepdims=True)              # (C, H)

            # Rank-1 structure: tiny dots for the v/h branches; bias folded
            # into the v branch (lands exactly once per un-padded pixel).
            vmat = jnp.dot(wv, v.astype(wv.dtype),
                           preferred_element_type=jnp.float32) + b   # (O, W)
            hmat = jnp.dot(wh, h.astype(wh.dtype),
                           preferred_element_type=jnp.float32)       # (O, H)
            vh = jnp.concatenate([vmat, hmat], axis=1).astype(st.dtype)  # (O, W+H)

            # Main x contribution + single fused broadcast-back dot.
            out = jnp.dot(wx, x, preferred_element_type=jnp.float32)     # (O, HWp)
            out = out + jnp.dot(vh, st, preferred_element_type=jnp.float32)
            o_ref[i] = out.astype(o_ref.dtype)
            return carry

        # Fully unrolled so the LLO scheduler sees the whole per-step body and
        # all ref indices are static.
        lax.fori_loop(0, B, body, 0, unroll=True)

    return kernel


def _pick_batch_block(n, max_b=8):
    """Largest divisor of n (<= max_b) that keeps grid length >= 2, so the
    'parallel' batch axis can still be split across v7x's two TensorCores."""
    divisors = [d for d in range(1, min(max_b, n) + 1) if n % d == 0]
    good = [d for d in divisors if n // d >= 2]
    return max(good) if good else max(divisors)


def acc_conv2d(x, weight, bias, *, mxu_dtype=jnp.bfloat16, batch_block=None):
    """AccConv2d forward.

    x: (N, C, H, W) f32, weight: (O, 3C, 1, 1), bias: (O,) -> (N, O, H, W) f32.
    mxu_dtype: dtype of the MXU operands (bf16 recommended on v5e/v6e/v7x);
    softmax math and all accumulation stay in f32.
    """
    N, C, H, W = x.shape
    O = weight.shape[0]
    assert weight.shape == (O, 3 * C, 1, 1)
    HW = H * W
    HWp = ((HW + 127) // 128) * 128          # lane-pad -> unmasked vst

    # Fused (O, 3C) weight, f32 bias column.
    w = jnp.asarray(weight.reshape(O, 3 * C), dtype=mxu_dtype)
    b = jnp.asarray(bias.reshape(O, 1), dtype=jnp.float32)

    # Lane-dense x layout (wrapper-side reshape/pad/cast is cheap XLA work).
    x_flat = x.reshape(N, C, HW).astype(mxu_dtype)
    if HWp != HW:
        x_flat = jnp.pad(x_flat, ((0, 0), (0, 0), (0, HWp - HW)))

    # Fused 0/1 selector matrices, built host-side with numpy once:
    #   S[hw, :W] = [hw % W == w']   (column-sum / broadcast-over-H selector)
    #   S[hw, W:] = [hw // W == h']  (row-sum    / broadcast-over-W selector)
    # Pad rows (hw >= HW) are zeroed so padded pixels contribute / receive 0.
    hw_idx = np.arange(HWp)
    s_np = np.concatenate(
        [(hw_idx[:, None] % W == np.arange(W)[None, :]),
         (hw_idx[:, None] // W == np.arange(H)[None, :])],
        axis=1).astype(np.float32)
    s_np[HW:, :] = 0.0
    s = jnp.asarray(s_np, dtype=mxu_dtype)                               # (HWp, W+H)
    st = jnp.asarray(np.ascontiguousarray(s_np.T), dtype=mxu_dtype)      # (W+H, HWp)

    B = batch_block if batch_block is not None else _pick_batch_block(N)
    assert N % B == 0
    grid = (N // B,)

    mxu_bytes = np.dtype(mxu_dtype).itemsize
    flops = (2 * N * C * HWp * (W + H)       # fused selector reductions
             + 2 * N * O * C * HWp           # main x contribution
             + 2 * N * O * C * (W + H)       # tiny v/h dots
             + 2 * N * O * (W + H) * HWp)    # fused broadcast-back
    transcendentals = N * C * (W + H)
    bytes_accessed = (N * C * HWp * mxu_bytes + N * O * HWp * 4
                      + O * 3 * C * mxu_bytes + O * 4
                      + 2 * HWp * (W + H) * mxu_bytes)

    out_flat = pl.pallas_call(
        _make_kernel(B, C, W, H),
        out_shape=jax.ShapeDtypeStruct((N, O, HWp), x.dtype),
        grid_spec=pltpu.PrefetchScalarGridSpec(
            num_scalar_prefetch=0,
            grid=grid,
            in_specs=[
                pl.BlockSpec((B, C, HWp), lambda n: (n, 0, 0)),
                # Grid-invariant operands: constant index_map -> never re-DMA'd.
                pl.BlockSpec((O, 3 * C), lambda n: (0, 0)),
                pl.BlockSpec((O, 1), lambda n: (0, 0)),
                pl.BlockSpec((HWp, W + H), lambda n: (0, 0)),
                pl.BlockSpec((W + H, HWp), lambda n: (0, 0)),
            ],
            out_specs=pl.BlockSpec((B, O, HWp), lambda n: (n, 0, 0)),
        ),
        compiler_params=pltpu.CompilerParams(
            dimension_semantics=("parallel",)),
        cost_estimate=pl.CostEstimate(
            flops=flops,
            transcendentals=transcendentals,
            bytes_accessed=bytes_accessed),
    )(x_flat, w, b, s, st)

    out = out_flat[..., :HW] if HWp != HW else out_flat
    return out.reshape(N, O, H, W)


def acc_conv2d_ref(x, weight, bias):
    """Pure-JAX reference mirroring the PyTorch forward."""
    v = jax.nn.softmax(x.sum(axis=-2, keepdims=True), axis=-1)
    v = jnp.broadcast_to(v, x.shape)
    h = jax.nn.softmax(x.sum(axis=-1, keepdims=True), axis=-2)
    h = jnp.broadcast_to(h, x.shape)
    cat = jnp.concatenate([x, v, h], axis=-3)                 # (N, 3C, H, W)
    w = weight.reshape(weight.shape[0], -1)                   # (O, 3C)
    out = jnp.einsum('oc,nchw->nohw', w, cat)
    return out + bias[None, :, None, None]


if __name__ == "__main__":
    N, C, H, W, O = 2, 4, 16, 16, 8

    key = jax.random.PRNGKey(0)
    kx, kw, kb = jax.random.split(key, 3)
    x = jax.random.normal(kx, (N, C, H, W), jnp.float32)

    # Deterministic parameter init matching Conv2d(3C, O, 1) shapes:
    # weight (O, 3C, 1, 1), bias (O,), uniform(-1/sqrt(fan_in), 1/sqrt(fan_in)).
    fan_in = 3 * C
    bound = 1.0 / np.sqrt(fan_in)
    weight = jax.random.uniform(kw, (O, 3 * C, 1, 1), jnp.float32, -bound, bound)
    bias = jax.random.uniform(kb, (O,), jnp.float32, -bound, bound)

    ref = acc_conv2d_ref(x, weight, bias)

    # Default (recommended) path: bf16 MXU operands, f32 softmax/accumulation.
    out_bf16 = acc_conv2d(x, weight, bias)
    jax.block_until_ready(out_bf16)
    assert out_bf16.shape == (N, O, H, W)
    np.testing.assert_allclose(np.asarray(out_bf16), np.asarray(ref),
                               rtol=5e-2, atol=5e-2)

    # f32 MXU-operand path for tight numerical validation.
    out_f32 = acc_conv2d(x, weight, bias, mxu_dtype=jnp.float32)
    jax.block_until_ready(out_f32)
    assert out_f32.shape == (N, O, H, W)
    np.testing.assert_allclose(np.asarray(out_f32), np.asarray(ref),
                               rtol=1e-5, atol=1e-5)

    print("KERNEL_OK")
</pallas_src>

<mosaic_0001>
module attributes {stable_mosaic.version = 11 : i64} {
  func.func @kernel(%arg0: i32, %arg1: memref<1x4x256xbf16, #tpu.memory_space<vmem>>, %arg2: memref<8x12xbf16, #tpu.memory_space<vmem>>, %arg3: memref<8x1xf32, #tpu.memory_space<vmem>>, %arg4: memref<256x32xbf16, #tpu.memory_space<vmem>>, %arg5: memref<32x256xbf16, #tpu.memory_space<vmem>>, %arg6: memref<1x8x256xf32, #tpu.memory_space<vmem>>) attributes {dimension_semantics = [#tpu.dimension_semantics<parallel>], iteration_bounds = array<i64: 2>, scalar_prefetch = 0 : i64, scratch_operands = 0 : i64, tpu.core_type = #tpu.core_type<tc>, window_params = [{transform_indices = @transform_0, window_bounds = array<i64: 1, 4, 256>}, {pipeline_mode = #tpu.pipeline_mode<synchronous>, transform_indices = @transform_1, window_bounds = array<i64: 8, 12>}, {pipeline_mode = #tpu.pipeline_mode<synchronous>, transform_indices = @transform_2, window_bounds = array<i64: 8, 1>}, {pipeline_mode = #tpu.pipeline_mode<synchronous>, transform_indices = @transform_3, window_bounds = array<i64: 256, 32>}, {pipeline_mode = #tpu.pipeline_mode<synchronous>, transform_indices = @transform_4, window_bounds = array<i64: 32, 256>}, {transform_indices = @transform_5, window_bounds = array<i64: 1, 8, 256>}]} {
    %c0 = arith.constant 0 : index
    %c0_0 = arith.constant 0 : index
    %0 = vector.load %arg2[%c0, %c0_0] : memref<8x12xbf16, #tpu.memory_space<vmem>>, vector<8x12xbf16>
    %1 = vector.extract_strided_slice %0 {offsets = [0, 0], sizes = [8, 4], strides = [1, 1]} : vector<8x12xbf16> to vector<8x4xbf16>
    %2 = vector.extract_strided_slice %0 {offsets = [0, 4], sizes = [8, 4], strides = [1, 1]} : vector<8x12xbf16> to vector<8x4xbf16>
    %3 = vector.extract_strided_slice %0 {offsets = [0, 8], sizes = [8, 4], strides = [1, 1]} : vector<8x12xbf16> to vector<8x4xbf16>
    %c0_1 = arith.constant 0 : index
    %c0_2 = arith.constant 0 : index
    %4 = vector.load %arg3[%c0_1, %c0_2] : memref<8x1xf32, #tpu.memory_space<vmem>>, vector<8x1xf32>
    %c0_3 = arith.constant 0 : index
    %c0_4 = arith.constant 0 : index
    %5 = vector.load %arg4[%c0_3, %c0_4] : memref<256x32xbf16, #tpu.memory_space<vmem>>, vector<256x32xbf16>
    %c0_5 = arith.constant 0 : index
    %c0_6 = arith.constant 0 : index
    %6 = vector.load %arg5[%c0_5, %c0_6] : memref<32x256xbf16, #tpu.memory_space<vmem>>, vector<32x256xbf16>
    %c0_i32 = arith.constant 0 : i32
    %7 = arith.index_cast %c0_i32 : i32 to index
    %c0_7 = arith.constant 0 : index
    %c0_8 = arith.constant 0 : index
    %8 = vector.load %arg1[%7, %c0_7, %c0_8] : memref<1x4x256xbf16, #tpu.memory_space<vmem>>, vector<1x4x256xbf16>
    %9 = vector.shape_cast %8 : vector<1x4x256xbf16> to vector<4x256xbf16>
    %cst = arith.constant dense<0.000000e+00> : vector<4x32xf32>
    %10 = tpu.matmul %9, %5, %cst {dimension_numbers = #tpu.dot_dimension_numbers<[1], [0], [0], [1], [0, 0, 1, 1], [], []>} : vector<4x256xbf16>, vector<256x32xbf16>, vector<4x32xf32> -> vector<4x32xf32>
    %11 = vector.extract_strided_slice %10 {offsets = [0, 0], sizes = [4, 16], strides = [1, 1]} : vector<4x32xf32> to vector<4x16xf32>
    %12 = vector.extract_strided_slice %10 {offsets = [0, 16], sizes = [4, 16], strides = [1, 1]} : vector<4x32xf32> to vector<4x16xf32>
    %cst_9 = arith.constant dense<0xFF800000> : vector<4xf32>
    %13 = vector.multi_reduction <maximumf>, %11, %cst_9 [1] : vector<4x16xf32> to vector<4xf32>
    %14 = vector.shape_cast %13 : vector<4xf32> to vector<4x1xf32>
    %15 = vector.broadcast %14 : vector<4x1xf32> to vector<4x16xf32>
    %16 = arith.subf %11, %15 : vector<4x16xf32>
    %17 = math.exp %16 : vector<4x16xf32>
    %cst_10 = arith.constant dense<0.000000e+00> : vector<4xf32>
    %18 = vector.multi_reduction <add>, %17, %cst_10 [1] : vector<4x16xf32> to vector<4xf32>
    %19 = vector.shape_cast %18 : vector<4xf32> to vector<4x1xf32>
    %20 = vector.broadcast %19 : vector<4x1xf32> to vector<4x16xf32>
    %21 = arith.divf %17, %20 : vector<4x16xf32>
    %cst_11 = arith.constant dense<0xFF800000> : vector<4xf32>
    %22 = vector.multi_reduction <maximumf>, %12, %cst_11 [1] : vector<4x16xf32> to vector<4xf32>
    %23 = vector.shape_cast %22 : vector<4xf32> to vector<4x1xf32>
    %24 = vector.broadcast %23 : vector<4x1xf32> to vector<4x16xf32>
    %25 = arith.subf %12, %24 : vector<4x16xf32>
    %26 = math.exp %25 : vector<4x16xf32>
    %cst_12 = arith.constant dense<0.000000e+00> : vector<4xf32>
    %27 = vector.multi_reduction <add>, %26, %cst_12 [1] : vector<4x16xf32> to vector<4xf32>
    %28 = vector.shape_cast %27 : vector<4xf32> to vector<4x1xf32>
    %29 = vector.broadcast %28 : vector<4x1xf32> to vector<4x16xf32>
    %30 = arith.divf %26, %29 : vector<4x16xf32>
    %31 = arith.truncf %21 : vector<4x16xf32> to vector<4x16xbf16>
    %cst_13 = arith.constant dense<0.000000e+00> : vector<8x16xf32>
    %32 = tpu.matmul %2, %31, %cst_13 {dimension_numbers = #tpu.dot_dimension_numbers<[1], [0], [0], [1], [0, 0, 1, 1], [], []>} : vector<8x4xbf16>, vector<4x16xbf16>, vector<8x16xf32> -> vector<8x16xf32>
    %33 = vector.broadcast %4 : vector<8x1xf32> to vector<8x16xf32>
    %34 = arith.addf %32, %33 : vector<8x16xf32>
    %35 = arith.truncf %30 : vector<4x16xf32> to vector<4x16xbf16>
    %cst_14 = arith.constant dense<0.000000e+00> : vector<8x16xf32>
    %36 = tpu.matmul %3, %35, %cst_14 {dimension_numbers = #tpu.dot_dimension_numbers<[1], [0], [0], [1], [0, 0, 1, 1], [], []>} : vector<8x4xbf16>, vector<4x16xbf16>, vector<8x16xf32> -> vector<8x16xf32>
    %37 = tpu.concatenate %34, %36 in 1 : vector<8x16xf32>, vector<8x16xf32> -> vector<8x32xf32>
    %38 = arith.truncf %37 : vector<8x32xf32> to vector<8x32xbf16>
    %cst_15 = arith.constant dense<0.000000e+00> : vector<8x256xf32>
    %39 = tpu.matmul %1, %9, %cst_15 {dimension_numbers = #tpu.dot_dimension_numbers<[1], [0], [0], [1], [0, 0, 1, 1], [], []>} : vector<8x4xbf16>, vector<4x256xbf16>, vector<8x256xf32> -> vector<8x256xf32>
    %cst_16 = arith.constant dense<0.000000e+00> : vector<8x256xf32>
    %40 = tpu.matmul %38, %6, %cst_16 {dimension_numbers = #tpu.dot_dimension_numbers<[1], [0], [0], [1], [0, 0, 1, 1], [], []>} : vector<8x32xbf16>, vector<32x256xbf16>, vector<8x256xf32> -> vector<8x256xf32>
    %41 = arith.addf %39, %40 : vector<8x256xf32>
    %42 = arith.index_cast %c0_i32 : i32 to index
    %c0_17 = arith.constant 0 : index
    %c0_18 = arith.constant 0 : index
    %43 = vector.load %arg6[%42, %c0_17, %c0_18] : memref<1x8x256xf32, #tpu.memory_space<vmem>>, vector<1x8x256xf32>
    %44 = vector.shape_cast %43 : vector<1x8x256xf32> to vector<8x256xf32>
    %45 = vector.shape_cast %41 : vector<8x256xf32> to vector<1x8x256xf32>
    tpu.vector_store %arg6[%42, %c0_17, %c0_18], %45 {strides = array<i32>} : memref<1x8x256xf32, #tpu.memory_space<vmem>>, vector<1x8x256xf32>,
    %c1_i32 = arith.constant 1 : i32
    return
  }
  func.func @transform_0(%arg0: i32) -> (i32, i32, i32) {
    %c0_i32 = arith.constant 0 : i32
    %c0_i32_0 = arith.constant 0 : i32
    %c0_i32_1 = arith.constant 0 : i32
    return %arg0, %c0_i32, %c0_i32_0 : i32, i32, i32
  }
  func.func @transform_1(%arg0: i32) -> (i32, i32) {
    %c0_i32 = arith.constant 0 : i32
    %c0_i32_0 = arith.constant 0 : i32
    %c0_i32_1 = arith.constant 0 : i32
    return %c0_i32, %c0_i32_0 : i32, i32
  }
  func.func @transform_2(%arg0: i32) -> (i32, i32) {
    %c0_i32 = arith.constant 0 : i32
    %c0_i32_0 = arith.constant 0 : i32
    %c0_i32_1 = arith.constant 0 : i32
    return %c0_i32, %c0_i32_0 : i32, i32
  }
  func.func @transform_3(%arg0: i32) -> (i32, i32) {
    %c0_i32 = arith.constant 0 : i32
    %c0_i32_0 = arith.constant 0 : i32
    %c0_i32_1 = arith.constant 0 : i32
    return %c0_i32, %c0_i32_0 : i32, i32
  }
  func.func @transform_4(%arg0: i32) -> (i32, i32) {
    %c0_i32 = arith.constant 0 : i32
    %c0_i32_0 = arith.constant 0 : i32
    %c0_i32_1 = arith.constant 0 : i32
    return %c0_i32, %c0_i32_0 : i32, i32
  }
  func.func @transform_5(%arg0: i32) -> (i32, i32, i32) {
    %c0_i32 = arith.constant 0 : i32
    %c0_i32_0 = arith.constant 0 : i32
    %c0_i32_1 = arith.constant 0 : i32
    return %arg0, %c0_i32, %c0_i32_0 : i32, i32, i32
  }
}

</mosaic_0001>

<bundles_post_ra>
// kernel: tpu_custom_call.1
= control target key start
LH: loop header
LB: loop body
LE: loop exit
PB: predicated region body
PF: predicated region fallthrough
CT: control target
= control target key end

     0   :  { %10 = vsyncpa [#allocation3], 0  ;;  %s1205_s0 = inlined_call_operand.vmem [shape: bf16[2,4,256], index: 0, kind: input, shape index: {}]   ;;  %s1206_s1 = inlined_call_operand.vmem [shape: bf16[8,12], index: 1, kind: input, shape index: {}]   ;;  %s1207_s2 = inlined_call_operand.vmem [shape: f32[8,1], index: 2, kind: input, shape index: {}]   ;;  %s1208_s3 = inlined_call_operand.vmem [shape: bf16[256,32], index: 3, kind: input, shape index: {}]   ;;  %s1209_s4 = inlined_call_operand.vmem [shape: bf16[32,256], index: 4, kind: input, shape index: {}]   ;;  %s1210_s5 = inlined_call_operand.hbm [shape: f32[2,8,256], index: 5, kind: output, shape index: {}]  }
   0x1   :  { %12 = vsyncpa [#allocation3 + $0x1], 0  ;;  %s1010_s18 = smov 0   ;;  %s1012_s19 = smov 0  }
   0x2   :  { %s1014_s20 = smov 0   ;;  %s1016_s21 = smov 0  }
   0x3 LB: > { %s1031_s22 = sadd.s32 4294967295, %s970_s21   ;;  %s747_s23 = sadd.s32 4294967294, %s970_s21   ;;  %s970_s21 = sphi %s1016_s21, %s1216_s21   ;;  %s966_s20 = sphi %s1014_s20, %s1215_s20   ;;  %s962_s19 = sphi %s1012_s19, %s1214_s19   ;;  %s958_s18 = sphi %s1010_s18, %s1213_s18  }
   0x4   : > { %s1035_s24 = sadd.s32 1, %s970_s21   ;;  %s135_s25 = sadd.s32 1, %s966_s20 }
   0x5   : > { %s132_s26 = ssub.s32 %s970_s21, %s1035_s24  ;;  %p145_p0 = scmp.ne.s32.totalorder %s966_s20, %s962_s19 }
   0x6   : > { %p133_p1 = scmp.eq.s32.totalorder %s132_s26, 0  ;;  %p146_p2 = scmp.eq.s32.totalorder %s1031_s22, 1 }
   0x7   : > { %p151_p3 = scmp.ne.s32.totalorder %s962_s19, %s958_s18  ;;  %p152_p4 = scmp.eq.s32.totalorder %s747_s23, 1 }
   0x8   : > { %s1046_s27 = scalar_select %p133_p1, %s966_s20, %s135_s25  }
   0x9   : > { %p1048_p5 = por %p146_p2, %p145_p0  ;;  %p1052_p6 = por %p152_p4, %p151_p3 }
   0xa   : > { %p750_p7 = scmp.ge.s32.totalorder %s970_s21, 1  ;;  %p190_p8 = scmp.lt.s32.totalorder %s970_s21, 3 }
   0xc   : > { %p191_p9 = pnand %p750_p7, %p190_p8 }
   0xd   : > { %v877_v0 = vld [vmem:[%s1208_s3 + $0x40] sm:$0xff] (!%p191_p9)   ;;  %v879_v2 = vld [vmem:[%s1208_s3 + $0x48] sm:$0xff] (!%p191_p9)   ;;  %p218_p10 = scmp.lt.s32.totalorder (!%p191_p9), %s1031_s22, 1  ;;  %v881_v4 = vld [vmem:[%s1208_s3 + $0x50] sm:$0xff] (!%p191_p9)   ;;  %vm422_vm0 = vcmask (!%p191_p9), 257152   ;;  %vm410_vm1 = vcmask (!%p191_p9), 125952  }
   0xe   : > { %194 = sbr.rel (%p191_p9) target bundleno = 1381 (0x565), region = 40  ;;  %v878_v1 = vld [vmem:[%s1208_s3] sm:$0xff] (!%p191_p9)   ;;  %788 = vmatprep.subr.bf16.mxu0 (!%p191_p9), %v877_v0  ;;  %v880_v3 = vld [vmem:[%s1208_s3 + $0x8] sm:$0xff] (!%p191_p9)   ;;  %v882_v5 = vld [vmem:[%s1208_s3 + $0x10] sm:$0xff] (!%p191_p9)   ;;  %s972_s10 = smov (!%p191_p9), 112   ;;  %v974_v38 = vmov (!%p191_p9), 0.0  }
   0xf   : > { %789 = vmatpush3.bf16.msra.mxu0 (!%p191_p9), %v878_v1  ;;  %v883_v6 = vld [vmem:[%s1208_s3 + $0x58] sm:$0xff] (!%p191_p9)   ;;  %v885_v8 = vld [vmem:[%s1208_s3 + $0x60] sm:$0xff] (!%p191_p9)   ;;  %v887_v10 = vld [vmem:[%s1208_s3 + $0x68] sm:$0xff] (!%p191_p9)   ;;  %s973_s13 = smov (!%p191_p9), 124   ;;  %814 = vmatprep.subr.bf16.mxu1 (!%p191_p9), %v974_v38  ;;  %s975_s14 = smov (!%p191_p9), 120   ;;  %vm976_vm2 = vmmov (!%p191_p9), 0  }
  0x10   : > { %790 = vmatprep.subr.bf16.mxu0 (!%p191_p9), %v879_v2  ;;  %v884_v7 = vld [vmem:[%s1208_s3 + $0x18] sm:$0xff] (!%p191_p9)   ;;  %v886_v9 = vld [vmem:[%s1208_s3 + $0x20] sm:$0xff] (!%p191_p9)   ;;  %v888_v13 = vld [vmem:[%s1208_s3 + $0x28] sm:$0xff] (!%p191_p9)   ;;  %816 = vmatprep.mubr.msk.bf16.mxu1 (!%p191_p9), %vm976_vm2, %v974_v38  ;;  %v977_v41 = vmov (!%p191_p9), 0   ;;  %vm453_vm3 = vcmask (!%p191_p9), 1041408   ;;  %vm449_vm4 = vcmask (!%p191_p9), 31744  }
  0x11   : > { %v889_v14 = vld [vmem:[%s1208_s3 + $0x70] sm:$0xff] (!%p191_p9)   ;;  %v891_v16 = vld [vmem:[%s1208_s3 + $0x78] sm:$0xff] (!%p191_p9)   ;;  %v1126_v36 = vld [vmem:[%s1206_s1] sm:$0xf] (!%p191_p9)  ;;  %876 = vset.pattern.permute.xlu0 (!%p191_p9), %v977_v41  ;;  %s978_s9 = smov (!%p191_p9), 16   ;;  %vm553_vm5 = vcmask (!%p191_p9), 130048  }
  0x12   : > { %v890_v15 = vld [vmem:[%s1208_s3 + $0x30] sm:$0xff] (!%p191_p9)   ;;  %v892_v17 = vld [vmem:[%s1208_s3 + $0x38] sm:$0xff] (!%p191_p9)   ;;  %v771_v37 = vcombine.low (!%p191_p9), %v1126_v36, %v1126_v36  ;;  %v225_v47 = vld [vmem:[%s1207_s2] sm:$0xff] (!%p191_p9)  ;;  %vm576_vm6 = vcmask (!%p191_p9), 261120  }
  0x13   : > { %791 = vmatpush3.bf16.msra.mxu0 (!%p191_p9), %v880_v3  ;;  %v894_v54 = vld [vmem:[%s1209_s4] ss:$8 sps:$4 sm:$0xff] (!%p191_p9)   ;;  %v896_v55 = vld [vmem:[%s1209_s4 + $0x4] ss:$8 sps:$4 sm:$0xff] (!%p191_p9)   ;;  %v899_v56 = vld [vmem:[%s1209_s4 + $0x14] ss:$8 sps:$4 sm:$0xff] (!%p191_p9)  }
  0x14   : > { %792 = vmatprep.subr.bf16.mxu0 (!%p191_p9), %v881_v4  ;;  %v897_v57 = vld [vmem:[%s1209_s4 + $0x10] ss:$8 sps:$4 sm:$0xff] (!%p191_p9)  }
  0x15   : > { %s219_s15 = scalar_select %p218_p10, %s1031_s22, 1 }
  0x17   : > { %s786_s26 = sshll.u32 %s219_s15, 2  ;;  %793 = vmatpush3.bf16.msra.mxu0 %v882_v5 }
  0x18   : > { %794 = vmatprep.subr.bf16.mxu0 %v883_v6  ;;  %s222_s11 = scalar_lea.vmem %s1205_s0, %s786_s26 }
  0x19   : > { %v1096_v11 = vld.sshfl [vmem:[%s222_s11] sm:$0x33 pattern:$0x76325410] }
  0x1a   : > { %v1100_v12 = vcombine.high %v1096_v11, %v1096_v11 }
  0x1b   : > { %795 = vmatpush3.bf16.msra.mxu0 %v884_v7  ;;  %v625_v7 = vsel %vm453_vm3, %v1096_v11, 0 }
  0x1c   : > { %796 = vmatprep.subr.bf16.mxu0 %v885_v8  ;;  %402 = vmatprep.mubr.bf16.mxu0 %v1100_v12 }
  0x1f   : > { %797 = vmatpush3.bf16.msra.mxu0 %v886_v9 }
  0x20   : > { %798 = vmatprep.subr.bf16.mxu0 %v887_v10 }
  0x23   : > { %799 = vmatpush3.bf16.msra.mxu0 %v888_v13 }
  0x24   : > { %800 = vmatprep.subr.bf16.mxu0 %v889_v14 }
  0x27   : > { %801 = vmatpush3.bf16.msra.mxu0 %v890_v15 }
  0x28   : > { %802 = vmatprep.subr.bf16.mxu0 %v891_v16 }
  0x2b   : > { %803 = vmatpush3.bf16.msra.mxu0 %v892_v17 }
  0x2e   : > { %403 = vmatmul.mubr.bf16.vlgmr.msra.gmra.mrb[0].mxu0 %v1096_v11 }
 0x101   : > { %v804_v18 = vpop.f32.mrb[0].mxu0 }
 0x102   : > { %v805_v19 = vpop.f32.mrb[1].mxu0 }
 0x103   : > { %v806_v20 = vadd.f32 %v805_v19, %v804_v18  ;;  %v807_v21 = vpop.f32.mrb[2].mxu0 }
 0x104   : > { %v808_v22 = vpop.f32.mrb[3].mxu0 }
 0x105   : > { %v423_v23 = vsel %vm422_vm0, %v806_v20, -inf  ;;  %v411_v24 = vsel %vm410_vm1, %v806_v20, -inf }
 0x106   : > { %424 = vmax.xlane.f32.xlu0 %v423_v23  ;;  %412 = vmax.xlane.f32.xlu1 %v411_v24 }
 0x193   : > { %v425_v25 = vpop.xlane.xlu0 %424  ;;  %v413_v29 = vpop.xlane.xlu1 %412 }
 0x194   : > { %v426_v26 = vsub.f32 %v806_v20, %v425_v25  ;;  %v414_v30 = vsub.f32 %v806_v20, %v413_v29 }
 0x196   : > { %v427_v27 = vmul.f32 1.442695, %v426_v26  ;;  %v415_v31 = vmul.f32 1.442695, %v414_v30 }
 0x198   : > { %900 = vpow2.f32 %v427_v27 }
 0x199   : > { %902 = vpow2.f32 %v415_v31 }
 0x1a2   : > { %v901_v28 = vpop.eup %900 }
 0x1a3   : > { %430 = vrot.lane.b32.xlu0 %v901_v28, %s972_s10  ;;  %v903_v34 = vpop.eup %902 }
 0x1a4   : > { %v417_v35 = vsel %vm410_vm1, %v903_v34, 0.0 }
 0x215   : > { %v431_v32 = vpop.permute.xlu0 %430 }
 0x216   : > { %v433_v33 = vsel %vm410_vm1, %v431_v32, 0.0 }
 0x217   : > { %434 = vadd.xlane.f32.xlu1 %v433_v33 }
 0x21b   : > { %418 = vadd.xlane.f32.xlu1 %v417_v35 }
 0x22c   : > { %447 = vrot.lane.b32.xlu1 %v771_v37, %s973_s13 }
 0x230   : > { %498 = vrot.lane.b32.xlu1 %v771_v37, %s975_s14  ;;  %s787_s14 = sshll.u32 %s1031_s22, 8  ;;  %s979_s22 = smov [#allocation2]  }
 0x231   : > { %s1165_s17 = scalar_lea.hbm %s1210_s5, %s787_s14  ;;  %s912_s26 = sshll.u32 %s979_s22, 4  ;;  %s913_s26 = int_to_ptr.vmem [resolvable:$false] %s912_s26 }
 0x232   : > { %s914_s30 = scalar_lea.vmem %s913_s26, 512 }
 0x2a4   : > { %v435_v39 = vpop.xlane.xlu1 %434 }
 0x2a5   : > { %904 = vrcp.f32 %v435_v39 }
 0x2a8   : > { %v419_v40 = vpop.xlane.xlu1 %418 }
 0x2a9   : > { %906 = vrcp.f32 %v419_v40 }
 0x2ac   : > { %v448_v50 = vpop.permute.xlu1 %447 }
 0x2af   : > { %v905_v42 = vpop.eup %904 }
 0x2b0   : > { %v437_v43 = vmul.f32 %v905_v42, %v901_v28  ;;  %v499_v53 = vpop.permute.xlu1 %498 }
 0x2b2   : > { %v497_v44 = vpack.c.bf16 %v437_v43, %v437_v43 }
 0x2b3   : > { %v907_v45 = vpop.eup %906 }
 0x2b4   : > { %501 = vrot.lane.b32.xlu0 %v497_v44, %s972_s10  ;;  %v421_v46 = vmul.f32 %v907_v45, %v903_v34  ;;  %s215_s10 = sand.u32 1, %s962_s19  }
 0x2b5   : > { %s751_s11 = sshll.u32 %s215_s10, 4  ;;  %s674_s23 = scalar_lea.sflag [#allocation3], %s215_s10 }
 0x2b6   : > { %v438_v48 = vpack.c.bf16 %v421_v46, %v421_v46  ;;  %s217_s12 = scalar_lea.vmem [#allocation2], %s751_s11 }
 0x2b7   : > { %s688_s13 = sshll.u32 %s217_s12, 4  ;;  %s1160_s13 = int_to_ptr.vmem [resolvable:$true] %s688_s13 }
 0x2b8   : > { %v455_v49 = vsel %vm453_vm3, %v438_v48, 0  ;;  %441 = vperm.xlu0 %876, %v225_v47   ;;  %s908_s25 = scalar_lea.vmem %s1160_s13, 256  ;;  %p915_p0 = scmp.lt.s32.totalorder %s1160_s13, %s913_s26 }
 0x2b9   : > { %815 = vmatpush3.bf16.msra.mxu1 %v455_v49  ;;  %p909_p11 = scmp.ne.s32.totalorder %s1160_s13, %s908_s25  ;;  %p916_p1 = scmp.lt.s32.totalorder %s914_s30, %s908_s25 }
 0x2ba   : > { %820 = vmatprep.subr.bf16.mxu1 %v974_v38 }
 0x2bb   : > { %p910_p12 = pnand %p909_p11, %p1048_p5  ;;  %p917_p2 = por %p916_p1, %p915_p0 }
 0x2bc   : > { %817 = vmatmul.mubr.msk.bf16.vlgmr.msra.gmra.mrb[0].mxu1 %vm449_vm4, %v448_v50 }
 0x2bd   : > { %822 = vmatprep.mubr.msk.bf16.mxu1 %vm976_vm2, %v974_v38  ;;  %p911_p13 = pneg %p910_p12 }
 0x2bf   : > { %p918_p3 = pnand %p917_p2, %p911_p13 }
 0x326   : > { %v502_v51 = vpop.permute.xlu0 %501 }
 0x327   : > { %v507_v52 = vsel %vm453_vm3, %v502_v51, 0 }
 0x328   : > { %821 = vmatpush3.bf16.msra.mxu1 %v507_v52 }
 0x329   : > { %580 = vmatprep.subr.bf16.mxu1 %v896_v55 }
 0x32b   : > { %823 = vmatmul.mubr.msk.bf16.vlgmr.msra.gmra.mrb[4].mxu1 %vm449_vm4, %v499_v53 }
 0x32c   : > { %612 = vmatprep.mubr.bf16.mxu1 %v977_v41  ;;  %581 = vmatpush1.bf16.msra.mxu1 %v894_v54 }
 0x32d   : > { %582 = vmatprep.subr.bf16.mxu1 %v899_v56 }
 0x330   : > { %583 = vmatpush1.bf16.msra.mxu1 %v897_v57 }
 0x331   : > { %779 = vmatprep.subr.msk.bf16.mxu1 %vm453_vm3, %v1100_v12 }
 0x337   : > { %v442_v2 = vpop.permute.xlu0 %441 }
 0x38f   : > { %v491_v58 = vpop.f32.mrb[0].mxu1 }
 0x390   : > { %v818_v59 = vpop.f32.mrb[1].mxu1  ;;  %v492_v3 = vadd.f32 %v491_v58, %v442_v2 }
 0x391   : > { %v494_v60 = vpop.f32.mrb[2].mxu1 }
 0x392   : > { %v819_v61 = vpop.f32.mrb[3].mxu1 }
 0x3fe   : > { %v543_v62 = vpop.f32.mrb[4].mxu1 }
 0x3ff   : > { %550 = vrot.lane.b32.xlu1 %v543_v62, %s978_s9  ;;  %v824_v63 = vpop.f32.mrb[5].mxu1 }
 0x400   : > { %v546_v0 = vpop.f32.mrb[6].mxu1 }
 0x401   : > { %v825_v1 = vpop.f32.mrb[7].mxu1 }
 0x471   : > { %v551_v4 = vpop.permute.xlu1 %550 }
 0x472   : > { %v554_v5 = vsel %vm553_vm5, %v492_v3, %v551_v4 }
 0x473   : > { %v555_v6 = vpack.c.bf16 %v554_v5, %v554_v5 }
 0x475   : > { %778 = vmatmul.mubr.msk.bf16.vlgmr.msra.gmra.mrb[8].mxu1 %vm576_vm6, %v555_v6 }
 0x476   : > { %631 = vmatpush1.bf16.msra.mxu1 %v625_v7  ;;  %662 = vmatprep.mubr.bf16.mxu1 %v977_v41 }
 0x481   : > { %780 = vmatmul.mubr.msk.bf16.vlgmr.msra.gmra.mrb[8].mxu1 %vm449_vm4, %v1126_v36 }
 0x554   : > { %v664_v8 = vpop.f32.mrb[8].mxu1 }
 0x555   : > { %671 = vst [vmem:[%s217_s12] sm:$0xff] %v664_v8  ;;  %v666_v9 = vpop.f32.mrb[9].mxu1 }
 0x556   : > { %672 = vst [vmem:[%s217_s12 + $0x8] sm:$0xff] %v666_v9  ;;  %v668_v10 = vpop.f32.mrb[10].mxu1 }
 0x557   : > { %v669_v11 = vpop.f32.mrb[11].mxu1 }
 0x558   : > { %921 = shalt.err (!%p918_p3)
}
 0x559   : > { %s922_s6 = scalar_lea.hbm %s1165_s17, 256  ;;  %s926_s9 = scalar_lea.hbm %s1210_s5, 512 }
 0x55a   : > { %p923_p4 = scmp.ne.s32.totalorder %s1165_s17, %s922_s6  ;;  %p927_p9 = scmp.lt.u32.totalorder %s1165_s17, %s1210_s5 }
 0x55b   : > { %p928_p10 = scmp.lt.u32.totalorder %s926_s9, %s922_s6  ;;  %p930_p12 = scmp.lt.u32.totalorder %s922_s6, %s1165_s17 }
 0x55c   : > { %p924_p7 = pnand %p923_p4, %p1048_p5 }
 0x55d   : > { %p929_p11 = por %p928_p10, %p927_p9 }
 0x55e   : > { %p925_p8 = pneg %p924_p7 }
 0x55f   : > { %p931_p13 = por %p930_p12, %p929_p11 }
 0x561   : > { %p932_p0 = pnand %p931_p13, %p925_p8 }
 0x563   : > { %935 = shalt.err (!%p932_p0)
}
 0x564   : > { %830 = dma.vmem_to_hbm [thread:$0]  (%p1048_p5), %s1160_s13, 256, %s1165_s17, %s674_s23  }
 0x565 PF: > { %p836_p1 = scmp.ge.s32.totalorder %s970_s21, 2  ;;  %s700_s12 = sand.u32 1, %s958_s18  }
 0x566   : > { %s701_s14 = scalar_lea.sflag [#allocation3], %s700_s12 }
 0x567   : > { %p833_p2 = pnand %p836_p1, %p1052_p6 }
 0x569   : > { %953 = dma.done.wait (!%p833_p2), %s701_s14, 256  }
 0x56a   : > { %955 = vsyncadd (!%p833_p2), %s701_s14, 4294967040  ;;  %p15_p3 = scmp.ge.s32.totalorder %s1035_s24, 4   ;;  %s1213_s18 = smov %s962_s19 }
 0x56b   : > { %s1214_s19 = smov %s966_s20  ;;  %s1215_s20 = smov %s1046_s27 }
 0x56c   : > { %s1216_s21 = smov %s1035_s24  ;;  %17 = sbr.rel (!%p15_p3) target bundleno = 3 (0x3), region = 75 }
 0x573   :  { %706 = vsyncpa [#allocation3], 1 }
 0x574   :  { %708 = vsyncpa [#allocation3 + $0x1], 1 }

</bundles_post_ra>
